<compile_context>
chip_gen: v7x
topology: tpu7x:2x2x1
jax: 0.10.0
libtpu: 0.0.40
codegen_flags: <defaults>
</compile_context>

<pallas_src>
import functools

import jax
import jax.numpy as jnp
from jax.experimental import pallas as pl
from jax.experimental.pallas import tpu as pltpu


# ---------------------------------------------------------------------------
# Kernel: one GCN aggregation  out = [relu]( A @ XW + b )
#   A      : (n_pad, n_pad)  bf16, streamed in (tm, tk) tiles
#   XW     : (n_pad, f_out)  bf16, pinned in VMEM, sliced with pl.ds per k
#   b      : (1, f_out)      f32, pinned
#   acc    : (tm, f_out)     f32 scratch, init at k==0, finalize at k==last
# ---------------------------------------------------------------------------
def gcn_agg_kernel(a_ref, xw_ref, b_ref, o_ref, acc_ref, *, tk, apply_relu):
    k = pl.program_id(1)

    @pl.when(k == 0)
    def _():
        acc_ref[...] = jnp.zeros_like(acc_ref)

    # Slice the VMEM-resident XW for this k-block (aligned dynamic slice).
    row0 = pl.multiple_of(k * tk, tk)
    acc_ref[...] += jnp.dot(
        a_ref[...],
        xw_ref[pl.ds(row0, tk), :],
        preferred_element_type=jnp.float32,
    )

    @pl.when(k == pl.num_programs(1) - 1)
    def _():
        h = acc_ref[...] + b_ref[...]
        if apply_relu:
            h = jnp.maximum(h, 0.0)
        o_ref[...] = h.astype(o_ref.dtype)


def gcn_aggregate(a_p, xw_p, b_p, *, apply_relu, out_dtype, tm, tk):
    n_pad = a_p.shape[0]
    f_out = xw_p.shape[1]
    assert n_pad % tm == 0 and n_pad % tk == 0
    assert f_out % 128 == 0

    # Explicit VMEM budget (feedback: v5e default scoped limit is 16 MiB,
    # v7x physical is 64 MiB) — derive from the actual footprint, clamp to 64 MiB.
    vmem_bytes = (
        2 * tm * tk * jnp.dtype(a_p.dtype).itemsize        # A tile, double-buffered
        + 2 * n_pad * f_out * jnp.dtype(xw_p.dtype).itemsize  # pinned XW (x2 conservative)
        + 2 * tm * f_out * jnp.dtype(out_dtype).itemsize    # out tile, double-buffered
        + tm * f_out * 4                                    # f32 accumulator
        + 2 * f_out * 4                                     # bias
    )
    vmem_limit = int(min(max(int(vmem_bytes * 1.5), 32 * 1024 * 1024),
                         64 * 1024 * 1024))

    kernel = functools.partial(gcn_agg_kernel, tk=tk, apply_relu=apply_relu)
    return pl.pallas_call(
        kernel,
        out_shape=jax.ShapeDtypeStruct((n_pad, f_out), out_dtype),
        grid_spec=pltpu.PrefetchScalarGridSpec(
            num_scalar_prefetch=0,
            grid=(n_pad // tm, n_pad // tk),
            in_specs=[
                pl.BlockSpec((tm, tk), lambda i, k: (i, k)),          # A tile (streamed)
                pl.BlockSpec((n_pad, f_out), lambda i, k: (0, 0)),    # XW (VMEM-pinned)
                pl.BlockSpec((1, f_out), lambda i, k: (0, 0)),        # bias (pinned)
            ],
            out_specs=pl.BlockSpec((tm, f_out), lambda i, k: (i, 0)),
            scratch_shapes=[pltpu.VMEM((tm, f_out), jnp.float32)],
        ),
        compiler_params=pltpu.CompilerParams(
            dimension_semantics=("parallel", "arbitrary"),
            vmem_limit_bytes=vmem_limit,
        ),
    )(a_p, xw_p, b_p)


# ---------------------------------------------------------------------------
# Plain-JAX glue
# ---------------------------------------------------------------------------
def normalized_adjacency(edge_index, num_nodes):
    """Dense D^{-1/2}(A + I)D^{-1/2}, matching PyG GCNConv defaults."""
    src, dst = edge_index[0], edge_index[1]
    a = jnp.zeros((num_nodes, num_nodes), jnp.float32)
    a = a.at[dst, src].add(1.0)                       # message src -> dst
    a = a + jnp.eye(num_nodes, dtype=jnp.float32)     # self loops
    deg = a.sum(axis=1)
    dinv = jnp.where(deg > 0, 1.0 / jnp.sqrt(deg), 0.0)
    return dinv[:, None] * a * dinv[None, :]


def _round_up(x, m):
    return ((x + m - 1) // m) * m


def _pad2d(x, rows, cols):
    return jnp.pad(x, ((0, rows - x.shape[0]), (0, cols - x.shape[1])))


def plan_tiling(num_nodes, target_tile=512):
    """Pick (n_pad, tile): large tiles for HBM-roofline efficiency, with >= 2
    row tiles where possible so the parallel axis can be megacore-sharded."""
    if num_nodes >= 2 * target_tile:
        return _round_up(num_nodes, target_tile), target_tile
    n_pad = _round_up(num_nodes, 128)
    for cand in (target_tile, 384, 256, 128):
        if cand <= n_pad and n_pad % cand == 0 and n_pad // cand >= 2:
            return n_pad, cand
    return n_pad, n_pad  # single-tile fallback (n_pad == 128)


def prepare_adjacency(edge_index, num_nodes, n_pad, dtype=jnp.bfloat16):
    """Hoisted out of the per-forward path: compute once, reuse every call."""
    a_hat = normalized_adjacency(edge_index, num_nodes)
    return _pad2d(a_hat, n_pad, n_pad).astype(dtype)


def encoder_forward(x, a_p, params, *, tile):
    """relu(GCNConv1(x)) -> GCNConv2, via two tiled Pallas aggregation calls.

    XW is precomputed (tiny matmul) so each Pallas call is a pure A @ XW + b
    aggregation with an f32 accumulator and fused bias/ReLU epilogue.
    """
    w1, b1, w2, b2 = params
    n, _ = x.shape
    hidden = w1.shape[1]
    n_pad = a_p.shape[0]
    h_pad = _round_up(hidden, 128)

    # Layer 1: XW1 in f32 (exact), padded, cast to bf16 for the MXU.
    xw1 = x.astype(jnp.float32) @ w1                              # (n, hidden) f32
    xw1_p = _pad2d(xw1, n_pad, h_pad).astype(jnp.bfloat16)
    b1_p = _pad2d(b1, 1, h_pad)                                   # f32
    h1 = gcn_aggregate(a_p, xw1_p, b1_p, apply_relu=True,
                       out_dtype=jnp.float32, tm=tile, tk=tile)   # (n_pad, h_pad) f32

    # Layer 2: XW2 = h1 @ W2 in f32, then bf16 for the aggregation kernel.
    w2_p = _pad2d(w2, h_pad, h_pad)                               # f32
    xw2_p = (h1 @ w2_p).astype(jnp.bfloat16)
    b2_p = _pad2d(b2, 1, h_pad)                                   # f32
    h2 = gcn_aggregate(a_p, xw2_p, b2_p, apply_relu=False,
                       out_dtype=jnp.float32, tm=tile, tk=tile)
    return h2[:n, :hidden]


def init_params(key, input_dim, hidden_dim):
    ks = jax.random.split(key, 2)

    def lin(k, fin, fout):
        w = jax.random.normal(k, (fin, fout), jnp.float32) * (1.0 / jnp.sqrt(fin))
        b = jnp.full((1, fout), 0.01, jnp.float32)
        return w, b

    w1, b1 = lin(ks[0], input_dim, hidden_dim)    # GCNConv1
    w2, b2 = lin(ks[1], hidden_dim, hidden_dim)   # GCNConv2
    return (w1, b1, w2, b2)


def encoder_reference(x, edge_index, params):
    """Pure-JAX f32 reference mirroring the PyTorch forward."""
    a_hat = normalized_adjacency(edge_index, x.shape[0])
    w1, b1, w2, b2 = params
    h = jnp.maximum(a_hat @ (x @ w1) + b1, 0.0)
    return a_hat @ (h @ w2) + b2


if __name__ == "__main__":
    key = jax.random.PRNGKey(0)
    k_x, k_p = jax.random.split(key)

    num_nodes = 256          # -> n_pad = 256, tile = 128, grid = (2, 2)
    input_dim, hidden_dim = 16, 32

    x = jax.random.normal(k_x, (num_nodes, input_dim), jnp.float32)

    # Undirected ring graph: edges (i, i+1) in both directions.
    src = jnp.arange(num_nodes, dtype=jnp.int32)
    dst = (src + 1) % num_nodes
    edge_index = jnp.stack(
        [jnp.concatenate([src, dst]), jnp.concatenate([dst, src])], axis=0
    )

    params = init_params(k_p, input_dim, hidden_dim)

    # Graph preprocessing hoisted out of the forward path (computed once).
    n_pad, tile = plan_tiling(num_nodes)
    a_p = jax.block_until_ready(prepare_adjacency(edge_index, num_nodes, n_pad))

    fwd = jax.jit(functools.partial(encoder_forward, tile=tile))
    out = fwd(x, a_p, params)
    jax.block_until_ready(out)

    ref = encoder_reference(x, edge_index, params)
    assert out.shape == (num_nodes, hidden_dim)
    # bf16 MXU inputs with f32 accumulation -> modest tolerance.
    assert jnp.allclose(out, ref, atol=3e-2, rtol=3e-2), (
        float(jnp.max(jnp.abs(out - ref)))
    )

    print("KERNEL_OK")
</pallas_src>

<mosaic_0001>
module attributes {stable_mosaic.version = 11 : i64} {
  func.func @gcn_agg_kernel(%arg0: i32, %arg1: i32, %arg2: memref<128x128xbf16, #tpu.memory_space<vmem>>, %arg3: memref<256x128xbf16, #tpu.memory_space<vmem>>, %arg4: memref<1x128xf32, #tpu.memory_space<vmem>>, %arg5: memref<128x128xf32, #tpu.memory_space<vmem>>, %arg6: memref<128x128xf32, #tpu.memory_space<vmem>>) attributes {dimension_semantics = [#tpu.dimension_semantics<parallel>, #tpu.dimension_semantics<arbitrary>], iteration_bounds = array<i64: 2, 2>, scalar_prefetch = 0 : i64, scratch_operands = 1 : i64, tpu.core_type = #tpu.core_type<tc>, window_params = [{transform_indices = @transform_0, window_bounds = array<i64: 128, 128>}, {pipeline_mode = #tpu.pipeline_mode<synchronous>, transform_indices = @transform_1, window_bounds = array<i64: 256, 128>}, {pipeline_mode = #tpu.pipeline_mode<synchronous>, transform_indices = @transform_2, window_bounds = array<i64: 1, 128>}, {transform_indices = @transform_3, window_bounds = array<i64: 128, 128>}]} {
    %c0_i32 = arith.constant 0 : i32
    %0 = arith.cmpi eq, %arg1, %c0_i32 : i32
    %1 = arith.extui %0 : i1 to i32
    %c0_i32_0 = arith.constant 0 : i32
    %2 = arith.cmpi ne, %1, %c0_i32_0 : i32
    scf.if %2 {
      %cst_8 = arith.constant 0.000000e+00 : f32
      %15 = vector.broadcast %cst_8 : f32 to vector<128x128xf32>
      %c0_9 = arith.constant 0 : index
      %c0_10 = arith.constant 0 : index
      %16 = vector.load %arg6[%c0_9, %c0_10] : memref<128x128xf32, #tpu.memory_space<vmem>>, vector<128x128xf32>
      tpu.vector_store %arg6[%c0_9, %c0_10], %15 {strides = array<i32>} : memref<128x128xf32, #tpu.memory_space<vmem>>, vector<128x128xf32>,
    } else {
    }
    %c128_i32 = arith.constant 128 : i32
    %3 = arith.muli %arg1, %c128_i32 : i32
    %4 = tpu.assume_multiple %3, 128 : i32
    %c0 = arith.constant 0 : index
    %c0_1 = arith.constant 0 : index
    %5 = vector.load %arg6[%c0, %c0_1] : memref<128x128xf32, #tpu.memory_space<vmem>>, vector<128x128xf32>
    %c0_2 = arith.constant 0 : index
    %c0_3 = arith.constant 0 : index
    %6 = vector.load %arg2[%c0_2, %c0_3] : memref<128x128xbf16, #tpu.memory_space<vmem>>, vector<128x128xbf16>
    %7 = arith.index_cast %4 : i32 to index
    %c0_4 = arith.constant 0 : index
    %8 = vector.load %arg3[%7, %c0_4] : memref<256x128xbf16, #tpu.memory_space<vmem>>, vector<128x128xbf16>
    %cst = arith.constant dense<0.000000e+00> : vector<128x128xf32>
    %9 = tpu.matmul %6, %8, %cst {dimension_numbers = #tpu.dot_dimension_numbers<[1], [0], [0], [1], [0, 0, 1, 1], [], []>} : vector<128x128xbf16>, vector<128x128xbf16>, vector<128x128xf32> -> vector<128x128xf32>
    %10 = arith.addf %5, %9 : vector<128x128xf32>
    %c0_5 = arith.constant 0 : index
    %c0_6 = arith.constant 0 : index
    %11 = vector.load %arg6[%c0_5, %c0_6] : memref<128x128xf32, #tpu.memory_space<vmem>>, vector<128x128xf32>
    tpu.vector_store %arg6[%c0_5, %c0_6], %10 {strides = array<i32>} : memref<128x128xf32, #tpu.memory_space<vmem>>, vector<128x128xf32>,
    %c1_i32 = arith.constant 1 : i32
    %12 = arith.cmpi eq, %arg1, %c1_i32 : i32
    %13 = arith.extui %12 : i1 to i32
    %c0_i32_7 = arith.constant 0 : i32
    %14 = arith.cmpi ne, %13, %c0_i32_7 : i32
    scf.if %14 {
      %c0_8 = arith.constant 0 : index
      %c0_9 = arith.constant 0 : index
      %15 = vector.load %arg6[%c0_8, %c0_9] : memref<128x128xf32, #tpu.memory_space<vmem>>, vector<128x128xf32>
      %c0_10 = arith.constant 0 : index
      %c0_11 = arith.constant 0 : index
      %16 = vector.load %arg4[%c0_10, %c0_11] : memref<1x128xf32, #tpu.memory_space<vmem>>, vector<1x128xf32>
      %17 = vector.broadcast %16 : vector<1x128xf32> to vector<128x128xf32>
      %18 = arith.addf %15, %17 : vector<128x128xf32>
      %cst_12 = arith.constant 0.000000e+00 : f32
      %19 = vector.broadcast %cst_12 : f32 to vector<128x128xf32>
      %20 = arith.maximumf %18, %19 : vector<128x128xf32>
      %c0_13 = arith.constant 0 : index
      %c0_14 = arith.constant 0 : index
      %21 = vector.load %arg5[%c0_13, %c0_14] : memref<128x128xf32, #tpu.memory_space<vmem>>, vector<128x128xf32>
      tpu.vector_store %arg5[%c0_13, %c0_14], %20 {strides = array<i32>} : memref<128x128xf32, #tpu.memory_space<vmem>>, vector<128x128xf32>,
    } else {
    }
    return
  }
  func.func @transform_0(%arg0: i32, %arg1: i32) -> (i32, i32) {
    %c0_i32 = arith.constant 0 : i32
    return %arg0, %arg1 : i32, i32
  }
  func.func @transform_1(%arg0: i32, %arg1: i32) -> (i32, i32) {
    %c0_i32 = arith.constant 0 : i32
    %c0_i32_0 = arith.constant 0 : i32
    %c0_i32_1 = arith.constant 0 : i32
    return %c0_i32, %c0_i32_0 : i32, i32
  }
  func.func @transform_2(%arg0: i32, %arg1: i32) -> (i32, i32) {
    %c0_i32 = arith.constant 0 : i32
    %c0_i32_0 = arith.constant 0 : i32
    %c0_i32_1 = arith.constant 0 : i32
    return %c0_i32, %c0_i32_0 : i32, i32
  }
  func.func @transform_3(%arg0: i32, %arg1: i32) -> (i32, i32) {
    %c0_i32 = arith.constant 0 : i32
    %c0_i32_0 = arith.constant 0 : i32
    return %arg0, %c0_i32 : i32, i32
  }
}

module attributes {stable_mosaic.version = 11 : i64} {
  func.func @gcn_agg_kernel(%arg0: i32, %arg1: i32, %arg2: memref<128x128xbf16, #tpu.memory_space<vmem>>, %arg3: memref<256x128xbf16, #tpu.memory_space<vmem>>, %arg4: memref<1x128xf32, #tpu.memory_space<vmem>>, %arg5: memref<128x128xf32, #tpu.memory_space<vmem>>, %arg6: memref<128x128xf32, #tpu.memory_space<vmem>>) attributes {dimension_semantics = [#tpu.dimension_semantics<parallel>, #tpu.dimension_semantics<arbitrary>], iteration_bounds = array<i64: 2, 2>, scalar_prefetch = 0 : i64, scratch_operands = 1 : i64, tpu.core_type = #tpu.core_type<tc>, window_params = [{transform_indices = @transform_0, window_bounds = array<i64: 128, 128>}, {pipeline_mode = #tpu.pipeline_mode<synchronous>, transform_indices = @transform_1, window_bounds = array<i64: 256, 128>}, {pipeline_mode = #tpu.pipeline_mode<synchronous>, transform_indices = @transform_2, window_bounds = array<i64: 1, 128>}, {transform_indices = @transform_3, window_bounds = array<i64: 128, 128>}]} {
    %c0_i32 = arith.constant 0 : i32
    %0 = arith.cmpi eq, %arg1, %c0_i32 : i32
    %1 = arith.extui %0 : i1 to i32
    %c0_i32_0 = arith.constant 0 : i32
    %2 = arith.cmpi ne, %1, %c0_i32_0 : i32
    scf.if %2 {
      %cst_8 = arith.constant 0.000000e+00 : f32
      %15 = vector.broadcast %cst_8 : f32 to vector<128x128xf32>
      %c0_9 = arith.constant 0 : index
      %c0_10 = arith.constant 0 : index
      %16 = vector.load %arg6[%c0_9, %c0_10] : memref<128x128xf32, #tpu.memory_space<vmem>>, vector<128x128xf32>
      tpu.vector_store %arg6[%c0_9, %c0_10], %15 {strides = array<i32>} : memref<128x128xf32, #tpu.memory_space<vmem>>, vector<128x128xf32>,
    } else {
    }
    %c128_i32 = arith.constant 128 : i32
    %3 = arith.muli %arg1, %c128_i32 : i32
    %4 = tpu.assume_multiple %3, 128 : i32
    %c0 = arith.constant 0 : index
    %c0_1 = arith.constant 0 : index
    %5 = vector.load %arg6[%c0, %c0_1] : memref<128x128xf32, #tpu.memory_space<vmem>>, vector<128x128xf32>
    %c0_2 = arith.constant 0 : index
    %c0_3 = arith.constant 0 : index
    %6 = vector.load %arg2[%c0_2, %c0_3] : memref<128x128xbf16, #tpu.memory_space<vmem>>, vector<128x128xbf16>
    %7 = arith.index_cast %4 : i32 to index
    %c0_4 = arith.constant 0 : index
    %8 = vector.load %arg3[%7, %c0_4] : memref<256x128xbf16, #tpu.memory_space<vmem>>, vector<128x128xbf16>
    %cst = arith.constant dense<0.000000e+00> : vector<128x128xf32>
    %9 = tpu.matmul %6, %8, %cst {dimension_numbers = #tpu.dot_dimension_numbers<[1], [0], [0], [1], [0, 0, 1, 1], [], []>} : vector<128x128xbf16>, vector<128x128xbf16>, vector<128x128xf32> -> vector<128x128xf32>
    %10 = arith.addf %5, %9 : vector<128x128xf32>
    %c0_5 = arith.constant 0 : index
    %c0_6 = arith.constant 0 : index
    %11 = vector.load %arg6[%c0_5, %c0_6] : memref<128x128xf32, #tpu.memory_space<vmem>>, vector<128x128xf32>
    tpu.vector_store %arg6[%c0_5, %c0_6], %10 {strides = array<i32>} : memref<128x128xf32, #tpu.memory_space<vmem>>, vector<128x128xf32>,
    %c1_i32 = arith.constant 1 : i32
    %12 = arith.cmpi eq, %arg1, %c1_i32 : i32
    %13 = arith.extui %12 : i1 to i32
    %c0_i32_7 = arith.constant 0 : i32
    %14 = arith.cmpi ne, %13, %c0_i32_7 : i32
    scf.if %14 {
      %c0_8 = arith.constant 0 : index
      %c0_9 = arith.constant 0 : index
      %15 = vector.load %arg6[%c0_8, %c0_9] : memref<128x128xf32, #tpu.memory_space<vmem>>, vector<128x128xf32>
      %c0_10 = arith.constant 0 : index
      %c0_11 = arith.constant 0 : index
      %16 = vector.load %arg4[%c0_10, %c0_11] : memref<1x128xf32, #tpu.memory_space<vmem>>, vector<1x128xf32>
      %17 = vector.broadcast %16 : vector<1x128xf32> to vector<128x128xf32>
      %18 = arith.addf %15, %17 : vector<128x128xf32>
      %c0_12 = arith.constant 0 : index
      %c0_13 = arith.constant 0 : index
      %19 = vector.load %arg5[%c0_12, %c0_13] : memref<128x128xf32, #tpu.memory_space<vmem>>, vector<128x128xf32>
      tpu.vector_store %arg5[%c0_12, %c0_13], %18 {strides = array<i32>} : memref<128x128xf32, #tpu.memory_space<vmem>>, vector<128x128xf32>,
    } else {
    }
    return
  }
  func.func @transform_0(%arg0: i32, %arg1: i32) -> (i32, i32) {
    %c0_i32 = arith.constant 0 : i32
    return %arg0, %arg1 : i32, i32
  }
  func.func @transform_1(%arg0: i32, %arg1: i32) -> (i32, i32) {
    %c0_i32 = arith.constant 0 : i32
    %c0_i32_0 = arith.constant 0 : i32
    %c0_i32_1 = arith.constant 0 : i32
    return %c0_i32, %c0_i32_0 : i32, i32
  }
  func.func @transform_2(%arg0: i32, %arg1: i32) -> (i32, i32) {
    %c0_i32 = arith.constant 0 : i32
    %c0_i32_0 = arith.constant 0 : i32
    %c0_i32_1 = arith.constant 0 : i32
    return %c0_i32, %c0_i32_0 : i32, i32
  }
  func.func @transform_3(%arg0: i32, %arg1: i32) -> (i32, i32) {
    %c0_i32 = arith.constant 0 : i32
    %c0_i32_0 = arith.constant 0 : i32
    return %arg0, %c0_i32 : i32, i32
  }
}

</mosaic_0001>

<bundles_post_ra>
// kernel: encoder_forward.3
= control target key start
LH: loop header
LB: loop body
LE: loop exit
PB: predicated region body
PF: predicated region fallthrough
CT: control target
= control target key end

     0   :  { %s977_s12 = smov 0   ;;  %s979_s13 = smov 0   ;;  %s1130_s0 = inlined_call_operand.vmem [shape: bf16[256,256], index: 0, kind: input, shape index: {}]   ;;  %s1131_s1 = inlined_call_operand.vmem [shape: bf16[256,128], index: 1, kind: input, shape index: {}]   ;;  %s1132_s2 = inlined_call_operand.vmem [shape: f32[1,128], index: 2, kind: input, shape index: {}]   ;;  %s1133_s3 = inlined_call_operand.vmem [shape: f32[256,128], index: 3, kind: output, shape index: {}]  }
   0x1   :  { %s981_s14 = smov 0   ;;  %s983_s15 = smov 0  }
   0x2   :  { %s985_s16 = smov 0   ;;  %s987_s17 = smov 0  }
   0x3   :  { %s989_s18 = smov 0  }
   0x4 LB: > { %s22_s19 = sadd.s32 1, %s946_s16  ;;  %s25_s20 = sadd.s32 1, %s950_s17  ;;  %s954_s18 = sphi %s989_s18, %s13_s18   ;;  %s950_s17 = sphi %s987_s17, %s1139_s17   ;;  %s946_s16 = sphi %s985_s16, %s1138_s16   ;;  %s942_s15 = sphi %s983_s15, %s1137_s15   ;;  %s938_s14 = sphi %s981_s14, %s1136_s14   ;;  %s934_s13 = sphi %s979_s13, %s1135_s13   ;;  %s930_s12 = sphi %s977_s12, %s1134_s12  }
   0x5   : > { %p23_p0 = scmp.ge.s32.totalorder %s22_s19, 2  ;;  %p41_p1 = scmp.ne.s32.totalorder %s934_s13, %s930_s12 }
   0x6   : > { %p42_p2 = scmp.eq.s32.totalorder %s954_s18, 0  ;;  %s34_s24 = sadd.s32 1, %s934_s13 }
   0x7   : > { %s1141_s19 = smov (%p23_p0, %s22_s19), 0  ;;  %s1143_s20 = smov (!%p23_p0, %s25_s20), %s950_s17 }
   0x8   : > { %p43_p3 = por %p42_p2, %p41_p1  ;;  %p27_p4 = scmp.ge.s32.totalorder %s1143_s20, 2 }
   0x9   : > { %s30_s21 = ssub.s32 %s946_s16, %s1141_s19  ;;  %p730_p6 = scmp.ge.s32.totalorder %s954_s18, 4 }
   0xa   : > { %s1145_s20 = smov (%p27_p4, %s1143_s20), 0 }
   0xb   : > { %s29_s22 = ssub.s32 %s950_s17, %s1145_s20  ;;  %141 = sbr.rel (%p730_p6) target bundleno = 34 (0x22), region = 24 }
   0xc   : > { %s31_s23 = sor.u32 %s30_s21, %s29_s22 }
   0xd   : > { %p32_p5 = scmp.eq.s32.totalorder %s31_s23, 0 }
   0xf   : > { %s1028_s25 = scalar_select %p32_p5, %s934_s13, %s34_s24  }
  0x12   : > { %144 = sbr.rel (!%p43_p3) target bundleno = 34 (0x22), region = 28  ;;  %s146_s26 = sand.u32 (%p43_p3), 1, %s934_s13  }
  0x13   : > { %s762_s27 = sshll.u32 (%p43_p3), %s950_s17, 5  ;;  %s731_s28 = sshll.u32 (%p43_p3), %s146_s26, 6 }
  0x14   : > { %s151_s29 = sadd.s32 (%p43_p3), %s946_s16, %s762_s27  ;;  %s148_s7 = scalar_lea.vmem (%p43_p3), [#allocation3], %s731_s28 }
  0x15   : > { %s734_s30 = sshll.u32 (%p43_p3), %s151_s29, 2 }
  0x16   : > { %s1037_s6 = scalar_lea.vmem (%p43_p3), %s1130_s0, %s734_s30 }
  0x17   : > { %v169_v0 = vld [vmem:[%s1037_s6] sm:$0xf] (%p43_p3)  ;;  %v171_v1 = vld [vmem:[%s1037_s6 + $0x8] sm:$0xf] (%p43_p3)  ;;  %v173_v2 = vld [vmem:[%s1037_s6 + $0x10] sm:$0xf] (%p43_p3) }
  0x18   : > { %170 = vst [vmem:[%s148_s7] sm:$0xf] (%p43_p3), %v169_v0  ;;  %172 = vst [vmem:[%s148_s7 + $0x4] sm:$0xf] (%p43_p3), %v171_v1  ;;  %v175_v3 = vld [vmem:[%s1037_s6 + $0x18] sm:$0xf] (%p43_p3) }
  0x19   : > { %174 = vst [vmem:[%s148_s7 + $0x8] sm:$0xf] %v173_v2  ;;  %v177_v4 = vld [vmem:[%s1037_s6 + $0x20] sm:$0xf]  ;;  %v179_v5 = vld [vmem:[%s1037_s6 + $0x28] sm:$0xf] }
  0x1a   : > { %176 = vst [vmem:[%s148_s7 + $0xc] sm:$0xf] %v175_v3  ;;  %178 = vst [vmem:[%s148_s7 + $0x10] sm:$0xf] %v177_v4  ;;  %v181_v6 = vld [vmem:[%s1037_s6 + $0x30] sm:$0xf] }
  0x1b   : > { %180 = vst [vmem:[%s148_s7 + $0x14] sm:$0xf] %v179_v5  ;;  %v183_v7 = vld [vmem:[%s1037_s6 + $0x38] sm:$0xf]  ;;  %v185_v8 = vld [vmem:[%s1037_s6 + $0x40] sm:$0xf] }
  0x1c   : > { %182 = vst [vmem:[%s148_s7 + $0x18] sm:$0xf] %v181_v6  ;;  %184 = vst [vmem:[%s148_s7 + $0x1c] sm:$0xf] %v183_v7  ;;  %v187_v9 = vld [vmem:[%s1037_s6 + $0x48] sm:$0xf] }
  0x1d   : > { %186 = vst [vmem:[%s148_s7 + $0x20] sm:$0xf] %v185_v8  ;;  %v189_v10 = vld [vmem:[%s1037_s6 + $0x50] sm:$0xf]  ;;  %v191_v11 = vld [vmem:[%s1037_s6 + $0x58] sm:$0xf] }
  0x1e   : > { %188 = vst [vmem:[%s148_s7 + $0x24] sm:$0xf] %v187_v9  ;;  %190 = vst [vmem:[%s148_s7 + $0x28] sm:$0xf] %v189_v10  ;;  %v193_v12 = vld [vmem:[%s1037_s6 + $0x60] sm:$0xf] }
  0x1f   : > { %192 = vst [vmem:[%s148_s7 + $0x2c] sm:$0xf] %v191_v11  ;;  %v195_v13 = vld [vmem:[%s1037_s6 + $0x68] sm:$0xf]  ;;  %v197_v14 = vld [vmem:[%s1037_s6 + $0x70] sm:$0xf] }
  0x20   : > { %194 = vst [vmem:[%s148_s7 + $0x30] sm:$0xf] %v193_v12  ;;  %196 = vst [vmem:[%s148_s7 + $0x34] sm:$0xf] %v195_v13  ;;  %v199_v15 = vld [vmem:[%s1037_s6 + $0x78] sm:$0xf] }
  0x21   : > { %198 = vst [vmem:[%s148_s7 + $0x38] sm:$0xf] %v197_v14  ;;  %200 = vst [vmem:[%s148_s7 + $0x3c] sm:$0xf] %v199_v15 }
  0x22 PF: > { %p735_p7 = scmp.ge.s32.totalorder %s954_s18, 1  ;;  %p254_p8 = scmp.lt.s32.totalorder %s954_s18, 5 }
  0x24   : > { %p255_p9 = pnand %p735_p7, %p254_p8 }
  0x25   : > { %s261_s8 = sand.u32 (!%p255_p9), 1, %s930_s12   ;;  %s737_s9 = sshll.u32 (!%p255_p9), %s942_s15, 4 }
  0x26   : > { %258 = sbr.rel (%p255_p9) target bundleno = 329 (0x149), region = 69  ;;  %s736_s10 = sshll.u32 (!%p255_p9), %s261_s8, 6 }
  0x27   : > { %p286_p10 = scmp.lt.s32.totalorder (!%p255_p9), %s737_s9, 31  ;;  %s1064_s24 = scalar_lea.vmem (!%p255_p9), [#allocation3], %s736_s10 }
  0x28   : > { %p739_p11 = scmp.ne.s32.totalorder (!%p255_p9), %s938_s14, 0 }
  0x2d   : > { %s1147_s9 = smov (!%p286_p10, %s737_s9), 31  ;;  %295 = sbr.rel (%p739_p11) target bundleno = 55 (0x37), region = 77 }
  0x2e   : > { %s738_s11 = sshll.u32 %s1147_s9, 3  ;;  %v956_v16 = vmov (!%p739_p11), 0.0  }
  0x2f   : > { %s1062_s23 = scalar_lea.vmem %s1133_s3, %s738_s11  ;;  %296 = vst [vmem:[#allocation2] sm:$0xff] (!%p739_p11), %v956_v16  ;;  %297 = vst [vmem:[#allocation2 + $0x8] sm:$0xff] (!%p739_p11), %v956_v16 }
  0x30   : > { %298 = vst [vmem:[#allocation2 + $0x10] sm:$0xff] (!%p739_p11), %v956_v16  ;;  %299 = vst [vmem:[#allocation2 + $0x18] sm:$0xff] (!%p739_p11), %v956_v16 }
  0x31   : > { %300 = vst [vmem:[#allocation2 + $0x20] sm:$0xff] (!%p739_p11), %v956_v16  ;;  %301 = vst [vmem:[#allocation2 + $0x28] sm:$0xff] (!%p739_p11), %v956_v16 }
  0x32   : > { %302 = vst [vmem:[#allocation2 + $0x30] sm:$0xff] (!%p739_p11), %v956_v16  ;;  %303 = vst [vmem:[#allocation2 + $0x38] sm:$0xff] (!%p739_p11), %v956_v16 }
  0x33   : > { %304 = vst [vmem:[#allocation2 + $0x40] sm:$0xff] (!%p739_p11), %v956_v16  ;;  %305 = vst [vmem:[#allocation2 + $0x48] sm:$0xff] (!%p739_p11), %v956_v16 }
  0x34   : > { %306 = vst [vmem:[#allocation2 + $0x50] sm:$0xff] %v956_v16  ;;  %307 = vst [vmem:[#allocation2 + $0x58] sm:$0xff] %v956_v16 }
  0x35   : > { %308 = vst [vmem:[#allocation2 + $0x60] sm:$0xff] %v956_v16  ;;  %309 = vst [vmem:[#allocation2 + $0x68] sm:$0xff] %v956_v16 }
  0x36   : > { %310 = vst [vmem:[#allocation2 + $0x70] sm:$0xff] %v956_v16  ;;  %311 = vst [vmem:[#allocation2 + $0x78] sm:$0xff] %v956_v16 }
  0x37 PF: > { %s740_s12 = sshll.u32 %s938_s14, 7  ;;  %v892_v17 = vld [vmem:[%s1064_s24] sm:$0xff]   ;;  %v894_v27 = vld [vmem:[%s1064_s24 + $0x8] sm:$0xff]   ;;  %v896_v29 = vld [vmem:[%s1064_s24 + $0x10] sm:$0xff]   ;;  %p758_p12 = scmp.ne.s32.totalorder %s938_s14, 1 }
  0x38   : > { %s345_s15 = sshra.s32 %s740_s12, 3  ;;  %v893_v18 = vld [vmem:[%s1064_s24 + $0x20] sm:$0xff]   ;;  %795 = vmatprep.mubr.bf16.mxu0 %v892_v17  ;;  %v895_v28 = vld [vmem:[%s1064_s24 + $0x28] sm:$0xff]   ;;  %v897_v30 = vld [vmem:[%s1064_s24 + $0x30] sm:$0xff]  }
  0x39   : > { %s741_s26 = sshll.u32 %s345_s15, 2  ;;  %803 = vmatprep.mubr.bf16.mxu1 %v893_v18  ;;  %v898_v31 = vld [vmem:[%s1064_s24 + $0x18] sm:$0xff]   ;;  %v313_v35 = vld [vmem:[#allocation2] sm:$0xff]  ;;  %v314_v45 = vld [vmem:[#allocation2 + $0x8] sm:$0xff] }
  0x3a   : > { %s1073_s29 = scalar_lea.vmem %s1131_s1, %s741_s26  ;;  %v899_v32 = vld [vmem:[%s1064_s24 + $0x38] sm:$0xff]   ;;  %v315_v33 = vld [vmem:[#allocation2 + $0x10] sm:$0xff]  ;;  %v759_v18 = vld [vmem:[%s1132_s2] ss:$0 sm:$0xff] (!%p758_p12) }
  0x3b   : > { %v884_v19 = vld [vmem:[%s1073_s29] sm:$0xff]   ;;  %v885_v20 = vld [vmem:[%s1073_s29 + $0x8] sm:$0xff]   ;;  %v886_v21 = vld [vmem:[%s1073_s29 + $0x10] sm:$0xff]  }
  0x3c   : > { %779 = vmatprep.subr.bf16.mxu0 %v884_v19  ;;  %811 = vmatprep.subr.bf16.mxu1 %v884_v19  ;;  %v887_v22 = vld [vmem:[%s1073_s29 + $0x18] sm:$0xff]   ;;  %v888_v23 = vld [vmem:[%s1073_s29 + $0x20] sm:$0xff]   ;;  %v889_v24 = vld [vmem:[%s1073_s29 + $0x28] sm:$0xff]  }
  0x3d   : > { %780 = vmatpush3.bf16.msra.mxu0 %v884_v19  ;;  %819 = vmatpush3.bf16.msra.mxu1 %v884_v19  ;;  %v890_v25 = vld [vmem:[%s1073_s29 + $0x30] sm:$0xff]   ;;  %v891_v26 = vld [vmem:[%s1073_s29 + $0x38] sm:$0xff]   ;;  %v321_v36 = vld [vmem:[#allocation2 + $0x40] sm:$0xff] }
  0x3e   : > { %781 = vmatprep.subr.bf16.mxu0 %v885_v20  ;;  %812 = vmatprep.subr.bf16.mxu1 %v885_v20  ;;  %v323_v34 = vld [vmem:[#allocation2 + $0x50] sm:$0xff]  ;;  %v316_v39 = vld [vmem:[#allocation2 + $0x18] sm:$0xff]  ;;  %v322_v46 = vld [vmem:[#allocation2 + $0x48] sm:$0xff] }
  0x3f   : > { %v324_v40 = vld [vmem:[#allocation2 + $0x58] sm:$0xff]  ;;  %v319_v57 = vld [vmem:[#allocation2 + $0x30] sm:$0xff]  ;;  %v317_v59 = vld [vmem:[#allocation2 + $0x20] sm:$0xff] }
  0x40   : > { %v327_v58 = vld [vmem:[#allocation2 + $0x70] sm:$0xff]  ;;  %v325_v60 = vld [vmem:[#allocation2 + $0x60] sm:$0xff]  ;;  %v320_v63 = vld [vmem:[#allocation2 + $0x38] sm:$0xff] }
  0x41   : > { %782 = vmatpush3.bf16.msra.mxu0 %v885_v20  ;;  %820 = vmatpush3.bf16.msra.mxu1 %v885_v20  ;;  %v328_v0 = vld [vmem:[#allocation2 + $0x78] sm:$0xff]  ;;  %v318_v5 = vld [vmem:[#allocation2 + $0x28] sm:$0xff] }
  0x42   : > { %783 = vmatprep.subr.bf16.mxu0 %v886_v21  ;;  %813 = vmatprep.subr.bf16.mxu1 %v886_v21  ;;  %v326_v6 = vld [vmem:[#allocation2 + $0x68] sm:$0xff] }
  0x45   : > { %784 = vmatpush3.bf16.msra.mxu0 %v886_v21  ;;  %821 = vmatpush3.bf16.msra.mxu1 %v886_v21 }
  0x46   : > { %785 = vmatprep.subr.bf16.mxu0 %v887_v22  ;;  %814 = vmatprep.subr.bf16.mxu1 %v887_v22 }
  0x49   : > { %786 = vmatpush3.bf16.msra.mxu0 %v887_v22  ;;  %822 = vmatpush3.bf16.msra.mxu1 %v887_v22 }
  0x4a   : > { %787 = vmatprep.subr.bf16.mxu0 %v888_v23  ;;  %815 = vmatprep.subr.bf16.mxu1 %v888_v23 }
  0x4d   : > { %788 = vmatpush3.bf16.msra.mxu0 %v888_v23  ;;  %823 = vmatpush3.bf16.msra.mxu1 %v888_v23 }
  0x4e   : > { %789 = vmatprep.subr.bf16.mxu0 %v889_v24  ;;  %816 = vmatprep.subr.bf16.mxu1 %v889_v24 }
  0x51   : > { %790 = vmatpush3.bf16.msra.mxu0 %v889_v24  ;;  %824 = vmatpush3.bf16.msra.mxu1 %v889_v24 }
  0x52   : > { %791 = vmatprep.subr.bf16.mxu0 %v890_v25  ;;  %817 = vmatprep.subr.bf16.mxu1 %v890_v25 }
  0x55   : > { %792 = vmatpush3.bf16.msra.mxu0 %v890_v25  ;;  %825 = vmatpush3.bf16.msra.mxu1 %v890_v25 }
  0x56   : > { %793 = vmatprep.subr.bf16.mxu0 %v891_v26  ;;  %818 = vmatprep.subr.bf16.mxu1 %v891_v26 }
  0x59   : > { %794 = vmatpush3.bf16.msra.mxu0 %v891_v26  ;;  %826 = vmatpush3.bf16.msra.mxu1 %v891_v26 }
  0x5c   : > { %796 = vmatmul.mubr.bf16.vlgmr.msra.gmra.mrb[0].mxu0 %v894_v27  ;;  %804 = vmatmul.mubr.bf16.vlgmr.msra.gmra.mrb[0].mxu1 %v895_v28 }
  0x5d   : > { %799 = vmatprep.mubr.bf16.mxu0 %v896_v29  ;;  %807 = vmatprep.mubr.bf16.mxu1 %v897_v30 }
  0x64   : > { %800 = vmatmul.mubr.bf16.gmra.mrb[4].mxu0 %v898_v31  ;;  %808 = vmatmul.mubr.bf16.gmra.mrb[4].mxu1 %v899_v32 }
 0x12f   : > { %v797_v37 = vpop.f32.mrb[0].mxu0  ;;  %v805_v38 = vpop.f32.mrb[0].mxu1 }
 0x130   : > { %v560_v41 = vadd.f32 %v797_v37, %v315_v33  ;;  %v568_v42 = vadd.f32 %v805_v38, %v323_v34  ;;  %v495_v43 = vpop.f32.mrb[1].mxu0  ;;  %v527_v44 = vpop.f32.mrb[1].mxu1 }
 0x131   : > { %v558_v47 = vadd.f32 %v495_v43, %v313_v35  ;;  %v566_v48 = vadd.f32 %v527_v44, %v321_v36  ;;  %v798_v49 = vpop.f32.mrb[2].mxu0  ;;  %v806_v50 = vpop.f32.mrb[2].mxu1 }
 0x132   : > { %576 = vst [vmem:[#allocation2 + $0x10] sm:$0xff] %v560_v41  ;;  %584 = vst [vmem:[#allocation2 + $0x50] sm:$0xff] %v568_v42  ;;  %v561_v51 = vadd.f32 %v798_v49, %v316_v39  ;;  %v569_v52 = vadd.f32 %v806_v50, %v324_v40  ;;  %v498_v53 = vpop.f32.mrb[3].mxu0  ;;  %v530_v54 = vpop.f32.mrb[3].mxu1 }
 0x133   : > { %574 = vst [vmem:[#allocation2] sm:$0xff] %v558_v47  ;;  %582 = vst [vmem:[#allocation2 + $0x40] sm:$0xff] %v566_v48  ;;  %v559_v55 = vadd.f32 %v498_v53, %v314_v45  ;;  %v567_v56 = vadd.f32 %v530_v54, %v322_v46 }
 0x134   : > { %577 = vst [vmem:[#allocation2 + $0x18] sm:$0xff] %v561_v51  ;;  %585 = vst [vmem:[#allocation2 + $0x58] sm:$0xff] %v569_v52 }
 0x135   : > { %575 = vst [vmem:[#allocation2 + $0x8] sm:$0xff] %v559_v55  ;;  %583 = vst [vmem:[#allocation2 + $0x48] sm:$0xff] %v567_v56 }
 0x137   : > { %v801_v61 = vpop.f32.mrb[4].mxu0  ;;  %v809_v62 = vpop.f32.mrb[4].mxu1  ;;  %593 = sbr.rel (%p758_p12) target bundleno = 329 (0x149), region = 81 }
 0x138   : > { %v564_v1 = vadd.f32 %v801_v61, %v319_v57  ;;  %v572_v2 = vadd.f32 %v809_v62, %v327_v58  ;;  %v511_v3 = vpop.f32.mrb[5].mxu0  ;;  %v543_v4 = vpop.f32.mrb[5].mxu1 }
 0x139   : > { %v562_v7 = vadd.f32 %v511_v3, %v317_v59  ;;  %v570_v8 = vadd.f32 %v543_v4, %v325_v60  ;;  %v802_v9 = vpop.f32.mrb[6].mxu0  ;;  %v810_v10 = vpop.f32.mrb[6].mxu1  ;;  %v596_v22 = vld [vmem:[#allocation2 + $0x10] sm:$0xff] (!%p758_p12) }
 0x13a   : > { %580 = vst [vmem:[#allocation2 + $0x30] sm:$0xff] %v564_v1  ;;  %588 = vst [vmem:[#allocation2 + $0x70] sm:$0xff] %v572_v2  ;;  %v565_v11 = vadd.f32 %v802_v9, %v320_v63  ;;  %v573_v12 = vadd.f32 %v810_v10, %v328_v0  ;;  %v514_v13 = vpop.f32.mrb[7].mxu0  ;;  %v546_v14 = vpop.f32.mrb[7].mxu1  ;;  %v594_v17 = vld [vmem:[#allocation2] sm:$0xff] (!%p758_p12)  ;;  %v619_v25 = vadd.f32 (!%p758_p12), %v759_v18, %v596_v22  ;;  %v604_v36 = vld [vmem:[#allocation2 + $0x50] sm:$0xff] (!%p758_p12) }
 0x13b   : > { %578 = vst [vmem:[#allocation2 + $0x20] sm:$0xff] %v562_v7  ;;  %586 = vst [vmem:[#allocation2 + $0x60] sm:$0xff] %v570_v8  ;;  %v563_v15 = vadd.f32 %v514_v13, %v318_v5  ;;  %v571_v16 = vadd.f32 %v546_v14, %v326_v6  ;;  %v617_v20 = vadd.f32 (!%p758_p12), %v759_v18, %v594_v17  ;;  %v597_v23 = vld [vmem:[#allocation2 + $0x18] sm:$0xff] (!%p758_p12)  ;;  %v602_v34 = vld [vmem:[#allocation2 + $0x40] sm:$0xff] (!%p758_p12) }
 0x13c   : > { %581 = vst [vmem:[#allocation2 + $0x38] sm:$0xff] %v565_v11  ;;  %589 = vst [vmem:[#allocation2 + $0x78] sm:$0xff] %v573_v12  ;;  %v595_v19 = vld [vmem:[#allocation2 + $0x8] sm:$0xff] (!%p758_p12)  ;;  %v620_v26 = vadd.f32 (!%p758_p12), %v759_v18, %v597_v23  ;;  %v625_v37 = vadd.f32 (!%p758_p12), %v759_v18, %v602_v34  ;;  %v627_v39 = vadd.f32 (!%p758_p12), %v759_v18, %v604_v36  ;;  %v605_v40 = vld [vmem:[#allocation2 + $0x58] sm:$0xff] (!%p758_p12) }
 0x13d   : > { %579 = vst [vmem:[#allocation2 + $0x28] sm:$0xff] %v563_v15  ;;  %587 = vst [vmem:[#allocation2 + $0x68] sm:$0xff] %v571_v16  ;;  %v618_v21 = vadd.f32 (!%p758_p12), %v759_v18, %v595_v19  ;;  %v603_v35 = vld [vmem:[#allocation2 + $0x48] sm:$0xff] (!%p758_p12)  ;;  %v628_v43 = vadd.f32 (!%p758_p12), %v759_v18, %v605_v40 }
 0x13e   : > { %633 = vst [vmem:[%s1062_s23] sm:$0xff] %v617_v20  ;;  %635 = vst [vmem:[%s1062_s23 + $0x10] sm:$0xff] %v619_v25  ;;  %v626_v38 = vadd.f32 %v759_v18, %v603_v35 }
 0x13f   : > { %634 = vst [vmem:[%s1062_s23 + $0x8] sm:$0xff] %v618_v21  ;;  %636 = vst [vmem:[%s1062_s23 + $0x18] sm:$0xff] %v620_v26 }
 0x140   : > { %641 = vst [vmem:[%s1062_s23 + $0x40] sm:$0xff] %v625_v37  ;;  %642 = vst [vmem:[%s1062_s23 + $0x48] sm:$0xff] %v626_v38 }
 0x141   : > { %v600_v29 = vld [vmem:[#allocation2 + $0x30] sm:$0xff]  ;;  %643 = vst [vmem:[%s1062_s23 + $0x50] sm:$0xff] %v627_v39  ;;  %644 = vst [vmem:[%s1062_s23 + $0x58] sm:$0xff] %v628_v43 }
 0x142   : > { %v598_v24 = vld [vmem:[#allocation2 + $0x20] sm:$0xff]  ;;  %v623_v32 = vadd.f32 %v759_v18, %v600_v29  ;;  %v608_v46 = vld [vmem:[#allocation2 + $0x70] sm:$0xff] }
 0x143   : > { %v621_v27 = vadd.f32 %v759_v18, %v598_v24  ;;  %v601_v30 = vld [vmem:[#allocation2 + $0x38] sm:$0xff]  ;;  %v606_v41 = vld [vmem:[#allocation2 + $0x60] sm:$0xff]  ;;  %v631_v48 = vadd.f32 %v759_v18, %v608_v46 }
 0x144   : > { %v599_v28 = vld [vmem:[#allocation2 + $0x28] sm:$0xff]  ;;  %v624_v33 = vadd.f32 %v759_v18, %v601_v30  ;;  %639 = vst [vmem:[%s1062_s23 + $0x30] sm:$0xff] %v623_v32  ;;  %v629_v44 = vadd.f32 %v759_v18, %v606_v41  ;;  %v609_v47 = vld [vmem:[#allocation2 + $0x78] sm:$0xff] }
 0x145   : > { %v622_v31 = vadd.f32 %v759_v18, %v599_v28  ;;  %637 = vst [vmem:[%s1062_s23 + $0x20] sm:$0xff] %v621_v27  ;;  %v607_v42 = vld [vmem:[#allocation2 + $0x68] sm:$0xff]  ;;  %v632_v49 = vadd.f32 %v759_v18, %v609_v47  ;;  %647 = vst [vmem:[%s1062_s23 + $0x70] sm:$0xff] %v631_v48 }
 0x146   : > { %640 = vst [vmem:[%s1062_s23 + $0x38] sm:$0xff] %v624_v33  ;;  %v630_v45 = vadd.f32 %v759_v18, %v607_v42  ;;  %645 = vst [vmem:[%s1062_s23 + $0x60] sm:$0xff] %v629_v44 }
 0x147   : > { %638 = vst [vmem:[%s1062_s23 + $0x28] sm:$0xff] %v622_v31  ;;  %648 = vst [vmem:[%s1062_s23 + $0x78] sm:$0xff] %v632_v49 }
 0x148   : > { %646 = vst [vmem:[%s1062_s23 + $0x68] sm:$0xff] %v630_v45 }
 0x149 PF: > { %s13_s18 = sadd.s32 1, %s954_s18   ;;  %s1134_s12 = smov %s934_s13 }
 0x14a   : > { %p10_p13 = scmp.ge.s32.totalorder %s13_s18, 6   ;;  %s1135_s13 = smov %s1028_s25 }
 0x14b   : > { %s1136_s14 = smov %s946_s16  ;;  %s1137_s15 = smov %s950_s17 }
 0x14c   : > { %s1138_s16 = smov %s1141_s19  ;;  %s1139_s17 = smov %s1145_s20 }
 0x14d   :  { %12 = sbr.rel (!%p10_p13) target bundleno = 4 (0x4), region = 117 }

// kernel: encoder_forward.2
= control target key start
LH: loop header
LB: loop body
LE: loop exit
PB: predicated region body
PF: predicated region fallthrough
CT: control target
= control target key end

     0   :  { %s993_s12 = smov 0   ;;  %s995_s13 = smov 0   ;;  %s1146_s0 = inlined_call_operand.vmem [shape: bf16[256,256], index: 0, kind: input, shape index: {}]   ;;  %s1147_s1 = inlined_call_operand.vmem [shape: bf16[256,128], index: 1, kind: input, shape index: {}]   ;;  %s1148_s2 = inlined_call_operand.vmem [shape: f32[1,128], index: 2, kind: input, shape index: {}]   ;;  %s1149_s3 = inlined_call_operand.vmem [shape: f32[256,128], index: 3, kind: output, shape index: {}]  }
   0x1   :  { %s997_s14 = smov 0   ;;  %s999_s15 = smov 0  }
   0x2   :  { %s1001_s16 = smov 0   ;;  %s1003_s17 = smov 0  }
   0x3   :  { %s1005_s18 = smov 0  }
   0x4 LB: > { %s22_s19 = sadd.s32 1, %s962_s16  ;;  %s25_s20 = sadd.s32 1, %s966_s17  ;;  %s970_s18 = sphi %s1005_s18, %s13_s18   ;;  %s966_s17 = sphi %s1003_s17, %s1155_s17   ;;  %s962_s16 = sphi %s1001_s16, %s1154_s16   ;;  %s958_s15 = sphi %s999_s15, %s1153_s15   ;;  %s954_s14 = sphi %s997_s14, %s1152_s14   ;;  %s950_s13 = sphi %s995_s13, %s1151_s13   ;;  %s946_s12 = sphi %s993_s12, %s1150_s12  }
   0x5   : > { %p23_p0 = scmp.ge.s32.totalorder %s22_s19, 2  ;;  %p41_p1 = scmp.ne.s32.totalorder %s950_s13, %s946_s12 }
   0x6   : > { %p42_p2 = scmp.eq.s32.totalorder %s970_s18, 0  ;;  %s34_s24 = sadd.s32 1, %s950_s13 }
   0x7   : > { %s1157_s19 = smov (%p23_p0, %s22_s19), 0  ;;  %s1159_s20 = smov (!%p23_p0, %s25_s20), %s966_s17 }
   0x8   : > { %p43_p3 = por %p42_p2, %p41_p1  ;;  %p27_p4 = scmp.ge.s32.totalorder %s1159_s20, 2 }
   0x9   : > { %s30_s21 = ssub.s32 %s962_s16, %s1157_s19  ;;  %p746_p6 = scmp.ge.s32.totalorder %s970_s18, 4 }
   0xa   : > { %s1161_s20 = smov (%p27_p4, %s1159_s20), 0 }
   0xb   : > { %s29_s22 = ssub.s32 %s966_s17, %s1161_s20  ;;  %141 = sbr.rel (%p746_p6) target bundleno = 34 (0x22), region = 24 }
   0xc   : > { %s31_s23 = sor.u32 %s30_s21, %s29_s22 }
   0xd   : > { %p32_p5 = scmp.eq.s32.totalorder %s31_s23, 0 }
   0xf   : > { %s1044_s25 = scalar_select %p32_p5, %s950_s13, %s34_s24  }
  0x12   : > { %144 = sbr.rel (!%p43_p3) target bundleno = 34 (0x22), region = 28  ;;  %s146_s26 = sand.u32 (%p43_p3), 1, %s950_s13  }
  0x13   : > { %s778_s27 = sshll.u32 (%p43_p3), %s966_s17, 5  ;;  %s747_s28 = sshll.u32 (%p43_p3), %s146_s26, 6 }
  0x14   : > { %s151_s29 = sadd.s32 (%p43_p3), %s962_s16, %s778_s27  ;;  %s148_s7 = scalar_lea.vmem (%p43_p3), [#allocation3], %s747_s28 }
  0x15   : > { %s750_s30 = sshll.u32 (%p43_p3), %s151_s29, 2 }
  0x16   : > { %s1053_s6 = scalar_lea.vmem (%p43_p3), %s1146_s0, %s750_s30 }
  0x17   : > { %v169_v0 = vld [vmem:[%s1053_s6] sm:$0xf] (%p43_p3)  ;;  %v171_v1 = vld [vmem:[%s1053_s6 + $0x8] sm:$0xf] (%p43_p3)  ;;  %v173_v2 = vld [vmem:[%s1053_s6 + $0x10] sm:$0xf] (%p43_p3) }
  0x18   : > { %170 = vst [vmem:[%s148_s7] sm:$0xf] (%p43_p3), %v169_v0  ;;  %172 = vst [vmem:[%s148_s7 + $0x4] sm:$0xf] (%p43_p3), %v171_v1  ;;  %v175_v3 = vld [vmem:[%s1053_s6 + $0x18] sm:$0xf] (%p43_p3) }
  0x19   : > { %174 = vst [vmem:[%s148_s7 + $0x8] sm:$0xf] %v173_v2  ;;  %v177_v4 = vld [vmem:[%s1053_s6 + $0x20] sm:$0xf]  ;;  %v179_v5 = vld [vmem:[%s1053_s6 + $0x28] sm:$0xf] }
  0x1a   : > { %176 = vst [vmem:[%s148_s7 + $0xc] sm:$0xf] %v175_v3  ;;  %178 = vst [vmem:[%s148_s7 + $0x10] sm:$0xf] %v177_v4  ;;  %v181_v6 = vld [vmem:[%s1053_s6 + $0x30] sm:$0xf] }
  0x1b   : > { %180 = vst [vmem:[%s148_s7 + $0x14] sm:$0xf] %v179_v5  ;;  %v183_v7 = vld [vmem:[%s1053_s6 + $0x38] sm:$0xf]  ;;  %v185_v8 = vld [vmem:[%s1053_s6 + $0x40] sm:$0xf] }
  0x1c   : > { %182 = vst [vmem:[%s148_s7 + $0x18] sm:$0xf] %v181_v6  ;;  %184 = vst [vmem:[%s148_s7 + $0x1c] sm:$0xf] %v183_v7  ;;  %v187_v9 = vld [vmem:[%s1053_s6 + $0x48] sm:$0xf] }
  0x1d   : > { %186 = vst [vmem:[%s148_s7 + $0x20] sm:$0xf] %v185_v8  ;;  %v189_v10 = vld [vmem:[%s1053_s6 + $0x50] sm:$0xf]  ;;  %v191_v11 = vld [vmem:[%s1053_s6 + $0x58] sm:$0xf] }
  0x1e   : > { %188 = vst [vmem:[%s148_s7 + $0x24] sm:$0xf] %v187_v9  ;;  %190 = vst [vmem:[%s148_s7 + $0x28] sm:$0xf] %v189_v10  ;;  %v193_v12 = vld [vmem:[%s1053_s6 + $0x60] sm:$0xf] }
  0x1f   : > { %192 = vst [vmem:[%s148_s7 + $0x2c] sm:$0xf] %v191_v11  ;;  %v195_v13 = vld [vmem:[%s1053_s6 + $0x68] sm:$0xf]  ;;  %v197_v14 = vld [vmem:[%s1053_s6 + $0x70] sm:$0xf] }
  0x20   : > { %194 = vst [vmem:[%s148_s7 + $0x30] sm:$0xf] %v193_v12  ;;  %196 = vst [vmem:[%s148_s7 + $0x34] sm:$0xf] %v195_v13  ;;  %v199_v15 = vld [vmem:[%s1053_s6 + $0x78] sm:$0xf] }
  0x21   : > { %198 = vst [vmem:[%s148_s7 + $0x38] sm:$0xf] %v197_v14  ;;  %200 = vst [vmem:[%s148_s7 + $0x3c] sm:$0xf] %v199_v15 }
  0x22 PF: > { %p751_p7 = scmp.ge.s32.totalorder %s970_s18, 1  ;;  %p254_p8 = scmp.lt.s32.totalorder %s970_s18, 5 }
  0x24   : > { %p255_p9 = pnand %p751_p7, %p254_p8 }
  0x25   : > { %s261_s8 = sand.u32 (!%p255_p9), 1, %s946_s12   ;;  %s753_s9 = sshll.u32 (!%p255_p9), %s958_s15, 4 }
  0x26   : > { %258 = sbr.rel (%p255_p9) target bundleno = 331 (0x14b), region = 69  ;;  %s752_s10 = sshll.u32 (!%p255_p9), %s261_s8, 6 }
  0x27   : > { %p286_p10 = scmp.lt.s32.totalorder (!%p255_p9), %s753_s9, 31  ;;  %s1080_s24 = scalar_lea.vmem (!%p255_p9), [#allocation3], %s752_s10 }
  0x28   : > { %p755_p11 = scmp.ne.s32.totalorder (!%p255_p9), %s954_s14, 0 }
  0x2d   : > { %s1163_s9 = smov (!%p286_p10, %s753_s9), 31  ;;  %295 = sbr.rel (%p755_p11) target bundleno = 55 (0x37), region = 77 }
  0x2e   : > { %s754_s11 = sshll.u32 %s1163_s9, 3  ;;  %v972_v16 = vmov (!%p755_p11), 0.0  }
  0x2f   : > { %s1078_s23 = scalar_lea.vmem %s1149_s3, %s754_s11  ;;  %296 = vst [vmem:[#allocation2] sm:$0xff] (!%p755_p11), %v972_v16  ;;  %297 = vst [vmem:[#allocation2 + $0x8] sm:$0xff] (!%p755_p11), %v972_v16 }
  0x30   : > { %298 = vst [vmem:[#allocation2 + $0x10] sm:$0xff] (!%p755_p11), %v972_v16  ;;  %299 = vst [vmem:[#allocation2 + $0x18] sm:$0xff] (!%p755_p11), %v972_v16 }
  0x31   : > { %300 = vst [vmem:[#allocation2 + $0x20] sm:$0xff] (!%p755_p11), %v972_v16  ;;  %301 = vst [vmem:[#allocation2 + $0x28] sm:$0xff] (!%p755_p11), %v972_v16 }
  0x32   : > { %302 = vst [vmem:[#allocation2 + $0x30] sm:$0xff] (!%p755_p11), %v972_v16  ;;  %303 = vst [vmem:[#allocation2 + $0x38] sm:$0xff] (!%p755_p11), %v972_v16 }
  0x33   : > { %304 = vst [vmem:[#allocation2 + $0x40] sm:$0xff] (!%p755_p11), %v972_v16  ;;  %305 = vst [vmem:[#allocation2 + $0x48] sm:$0xff] (!%p755_p11), %v972_v16 }
  0x34   : > { %306 = vst [vmem:[#allocation2 + $0x50] sm:$0xff] %v972_v16  ;;  %307 = vst [vmem:[#allocation2 + $0x58] sm:$0xff] %v972_v16 }
  0x35   : > { %308 = vst [vmem:[#allocation2 + $0x60] sm:$0xff] %v972_v16  ;;  %309 = vst [vmem:[#allocation2 + $0x68] sm:$0xff] %v972_v16 }
  0x36   : > { %310 = vst [vmem:[#allocation2 + $0x70] sm:$0xff] %v972_v16  ;;  %311 = vst [vmem:[#allocation2 + $0x78] sm:$0xff] %v972_v16 }
  0x37 PF: > { %s756_s12 = sshll.u32 %s954_s14, 7  ;;  %v908_v17 = vld [vmem:[%s1080_s24] sm:$0xff]   ;;  %v910_v27 = vld [vmem:[%s1080_s24 + $0x8] sm:$0xff]   ;;  %v912_v29 = vld [vmem:[%s1080_s24 + $0x10] sm:$0xff]   ;;  %p774_p12 = scmp.ne.s32.totalorder %s954_s14, 1 }
  0x38   : > { %s345_s15 = sshra.s32 %s756_s12, 3  ;;  %v909_v18 = vld [vmem:[%s1080_s24 + $0x20] sm:$0xff]   ;;  %811 = vmatprep.mubr.bf16.mxu0 %v908_v17  ;;  %v911_v28 = vld [vmem:[%s1080_s24 + $0x28] sm:$0xff]   ;;  %v913_v30 = vld [vmem:[%s1080_s24 + $0x30] sm:$0xff]  }
  0x39   : > { %s757_s26 = sshll.u32 %s345_s15, 2  ;;  %819 = vmatprep.mubr.bf16.mxu1 %v909_v18  ;;  %v914_v31 = vld [vmem:[%s1080_s24 + $0x18] sm:$0xff]   ;;  %v313_v35 = vld [vmem:[#allocation2] sm:$0xff]  ;;  %v314_v45 = vld [vmem:[#allocation2 + $0x8] sm:$0xff] }
  0x3a   : > { %s1089_s29 = scalar_lea.vmem %s1147_s1, %s757_s26  ;;  %v915_v32 = vld [vmem:[%s1080_s24 + $0x38] sm:$0xff]   ;;  %v315_v33 = vld [vmem:[#allocation2 + $0x10] sm:$0xff]  ;;  %v775_v18 = vld [vmem:[%s1148_s2] ss:$0 sm:$0xff] (!%p774_p12) }
  0x3b   : > { %v900_v19 = vld [vmem:[%s1089_s29] sm:$0xff]   ;;  %v901_v20 = vld [vmem:[%s1089_s29 + $0x8] sm:$0xff]   ;;  %v902_v21 = vld [vmem:[%s1089_s29 + $0x10] sm:$0xff]  }
  0x3c   : > { %795 = vmatprep.subr.bf16.mxu0 %v900_v19  ;;  %827 = vmatprep.subr.bf16.mxu1 %v900_v19  ;;  %v903_v22 = vld [vmem:[%s1089_s29 + $0x18] sm:$0xff]   ;;  %v904_v23 = vld [vmem:[%s1089_s29 + $0x20] sm:$0xff]   ;;  %v905_v24 = vld [vmem:[%s1089_s29 + $0x28] sm:$0xff]  }
  0x3d   : > { %796 = vmatpush3.bf16.msra.mxu0 %v900_v19  ;;  %835 = vmatpush3.bf16.msra.mxu1 %v900_v19  ;;  %v906_v25 = vld [vmem:[%s1089_s29 + $0x30] sm:$0xff]   ;;  %v907_v26 = vld [vmem:[%s1089_s29 + $0x38] sm:$0xff]   ;;  %v321_v36 = vld [vmem:[#allocation2 + $0x40] sm:$0xff] }
  0x3e   : > { %797 = vmatprep.subr.bf16.mxu0 %v901_v20  ;;  %828 = vmatprep.subr.bf16.mxu1 %v901_v20  ;;  %v323_v34 = vld [vmem:[#allocation2 + $0x50] sm:$0xff]  ;;  %v316_v39 = vld [vmem:[#allocation2 + $0x18] sm:$0xff]  ;;  %v322_v46 = vld [vmem:[#allocation2 + $0x48] sm:$0xff] }
  0x3f   : > { %v324_v40 = vld [vmem:[#allocation2 + $0x58] sm:$0xff]  ;;  %v319_v57 = vld [vmem:[#allocation2 + $0x30] sm:$0xff]  ;;  %v317_v59 = vld [vmem:[#allocation2 + $0x20] sm:$0xff] }
  0x40   : > { %v327_v58 = vld [vmem:[#allocation2 + $0x70] sm:$0xff]  ;;  %v325_v60 = vld [vmem:[#allocation2 + $0x60] sm:$0xff]  ;;  %v320_v63 = vld [vmem:[#allocation2 + $0x38] sm:$0xff] }
  0x41   : > { %798 = vmatpush3.bf16.msra.mxu0 %v901_v20  ;;  %836 = vmatpush3.bf16.msra.mxu1 %v901_v20  ;;  %v328_v0 = vld [vmem:[#allocation2 + $0x78] sm:$0xff]  ;;  %v318_v5 = vld [vmem:[#allocation2 + $0x28] sm:$0xff] }
  0x42   : > { %799 = vmatprep.subr.bf16.mxu0 %v902_v21  ;;  %829 = vmatprep.subr.bf16.mxu1 %v902_v21  ;;  %v326_v6 = vld [vmem:[#allocation2 + $0x68] sm:$0xff] }
  0x45   : > { %800 = vmatpush3.bf16.msra.mxu0 %v902_v21  ;;  %837 = vmatpush3.bf16.msra.mxu1 %v902_v21 }
  0x46   : > { %801 = vmatprep.subr.bf16.mxu0 %v903_v22  ;;  %830 = vmatprep.subr.bf16.mxu1 %v903_v22 }
  0x49   : > { %802 = vmatpush3.bf16.msra.mxu0 %v903_v22  ;;  %838 = vmatpush3.bf16.msra.mxu1 %v903_v22 }
  0x4a   : > { %803 = vmatprep.subr.bf16.mxu0 %v904_v23  ;;  %831 = vmatprep.subr.bf16.mxu1 %v904_v23 }
  0x4d   : > { %804 = vmatpush3.bf16.msra.mxu0 %v904_v23  ;;  %839 = vmatpush3.bf16.msra.mxu1 %v904_v23 }
  0x4e   : > { %805 = vmatprep.subr.bf16.mxu0 %v905_v24  ;;  %832 = vmatprep.subr.bf16.mxu1 %v905_v24 }
  0x51   : > { %806 = vmatpush3.bf16.msra.mxu0 %v905_v24  ;;  %840 = vmatpush3.bf16.msra.mxu1 %v905_v24 }
  0x52   : > { %807 = vmatprep.subr.bf16.mxu0 %v906_v25  ;;  %833 = vmatprep.subr.bf16.mxu1 %v906_v25 }
  0x55   : > { %808 = vmatpush3.bf16.msra.mxu0 %v906_v25  ;;  %841 = vmatpush3.bf16.msra.mxu1 %v906_v25 }
  0x56   : > { %809 = vmatprep.subr.bf16.mxu0 %v907_v26  ;;  %834 = vmatprep.subr.bf16.mxu1 %v907_v26 }
  0x59   : > { %810 = vmatpush3.bf16.msra.mxu0 %v907_v26  ;;  %842 = vmatpush3.bf16.msra.mxu1 %v907_v26 }
  0x5c   : > { %812 = vmatmul.mubr.bf16.vlgmr.msra.gmra.mrb[0].mxu0 %v910_v27  ;;  %820 = vmatmul.mubr.bf16.vlgmr.msra.gmra.mrb[0].mxu1 %v911_v28 }
  0x5d   : > { %815 = vmatprep.mubr.bf16.mxu0 %v912_v29  ;;  %823 = vmatprep.mubr.bf16.mxu1 %v913_v30 }
  0x64   : > { %816 = vmatmul.mubr.bf16.gmra.mrb[4].mxu0 %v914_v31  ;;  %824 = vmatmul.mubr.bf16.gmra.mrb[4].mxu1 %v915_v32 }
 0x12f   : > { %v813_v37 = vpop.f32.mrb[0].mxu0  ;;  %v821_v38 = vpop.f32.mrb[0].mxu1 }
 0x130   : > { %v560_v41 = vadd.f32 %v813_v37, %v315_v33  ;;  %v568_v42 = vadd.f32 %v821_v38, %v323_v34  ;;  %v495_v43 = vpop.f32.mrb[1].mxu0  ;;  %v527_v44 = vpop.f32.mrb[1].mxu1 }
 0x131   : > { %v558_v47 = vadd.f32 %v495_v43, %v313_v35  ;;  %v566_v48 = vadd.f32 %v527_v44, %v321_v36  ;;  %v814_v49 = vpop.f32.mrb[2].mxu0  ;;  %v822_v50 = vpop.f32.mrb[2].mxu1 }
 0x132   : > { %576 = vst [vmem:[#allocation2 + $0x10] sm:$0xff] %v560_v41  ;;  %584 = vst [vmem:[#allocation2 + $0x50] sm:$0xff] %v568_v42  ;;  %v561_v51 = vadd.f32 %v814_v49, %v316_v39  ;;  %v569_v52 = vadd.f32 %v822_v50, %v324_v40  ;;  %v498_v53 = vpop.f32.mrb[3].mxu0  ;;  %v530_v54 = vpop.f32.mrb[3].mxu1 }
 0x133   : > { %574 = vst [vmem:[#allocation2] sm:$0xff] %v558_v47  ;;  %582 = vst [vmem:[#allocation2 + $0x40] sm:$0xff] %v566_v48  ;;  %v559_v55 = vadd.f32 %v498_v53, %v314_v45  ;;  %v567_v56 = vadd.f32 %v530_v54, %v322_v46 }
 0x134   : > { %577 = vst [vmem:[#allocation2 + $0x18] sm:$0xff] %v561_v51  ;;  %585 = vst [vmem:[#allocation2 + $0x58] sm:$0xff] %v569_v52 }
 0x135   : > { %575 = vst [vmem:[#allocation2 + $0x8] sm:$0xff] %v559_v55  ;;  %583 = vst [vmem:[#allocation2 + $0x48] sm:$0xff] %v567_v56 }
 0x137   : > { %v817_v61 = vpop.f32.mrb[4].mxu0  ;;  %v825_v62 = vpop.f32.mrb[4].mxu1  ;;  %593 = sbr.rel (%p774_p12) target bundleno = 331 (0x14b), region = 81 }
 0x138   : > { %v564_v1 = vadd.f32 %v817_v61, %v319_v57  ;;  %v572_v2 = vadd.f32 %v825_v62, %v327_v58  ;;  %v511_v3 = vpop.f32.mrb[5].mxu0  ;;  %v543_v4 = vpop.f32.mrb[5].mxu1 }
 0x139   : > { %v562_v7 = vadd.f32 %v511_v3, %v317_v59  ;;  %v570_v8 = vadd.f32 %v543_v4, %v325_v60  ;;  %v818_v9 = vpop.f32.mrb[6].mxu0  ;;  %v826_v10 = vpop.f32.mrb[6].mxu1  ;;  %v596_v22 = vld [vmem:[#allocation2 + $0x10] sm:$0xff] (!%p774_p12) }
 0x13a   : > { %580 = vst [vmem:[#allocation2 + $0x30] sm:$0xff] %v564_v1  ;;  %588 = vst [vmem:[#allocation2 + $0x70] sm:$0xff] %v572_v2  ;;  %v565_v11 = vadd.f32 %v818_v9, %v320_v63  ;;  %v573_v12 = vadd.f32 %v826_v10, %v328_v0  ;;  %v514_v13 = vpop.f32.mrb[7].mxu0  ;;  %v546_v14 = vpop.f32.mrb[7].mxu1  ;;  %v594_v17 = vld [vmem:[#allocation2] sm:$0xff] (!%p774_p12)  ;;  %v619_v25 = vadd.f32 (!%p774_p12), %v775_v18, %v596_v22  ;;  %v604_v37 = vld [vmem:[#allocation2 + $0x50] sm:$0xff] (!%p774_p12) }
 0x13b   : > { %578 = vst [vmem:[#allocation2 + $0x20] sm:$0xff] %v562_v7  ;;  %586 = vst [vmem:[#allocation2 + $0x60] sm:$0xff] %v570_v8  ;;  %v563_v15 = vadd.f32 %v514_v13, %v318_v5  ;;  %v571_v16 = vadd.f32 %v546_v14, %v326_v6  ;;  %v617_v20 = vadd.f32 (!%p774_p12), %v775_v18, %v594_v17  ;;  %v597_v23 = vld [vmem:[#allocation2 + $0x18] sm:$0xff] (!%p774_p12)  ;;  %v602_v35 = vld [vmem:[#allocation2 + $0x40] sm:$0xff] (!%p774_p12) }
 0x13c   : > { %581 = vst [vmem:[#allocation2 + $0x38] sm:$0xff] %v565_v11  ;;  %589 = vst [vmem:[#allocation2 + $0x78] sm:$0xff] %v573_v12  ;;  %v595_v19 = vld [vmem:[#allocation2 + $0x8] sm:$0xff] (!%p774_p12)  ;;  %v620_v26 = vadd.f32 (!%p774_p12), %v775_v18, %v597_v23  ;;  %v635_v38 = vmax.f32 (!%p774_p12), %v619_v25, 0.0  ;;  %v605_v42 = vld [vmem:[#allocation2 + $0x58] sm:$0xff] (!%p774_p12)  ;;  %v625_v47 = vadd.f32 (!%p774_p12), %v775_v18, %v602_v35  ;;  %v627_v52 = vadd.f32 (!%p774_p12), %v775_v18, %v604_v37 }
 0x13d   : > { %579 = vst [vmem:[#allocation2 + $0x28] sm:$0xff] %v563_v15  ;;  %587 = vst [vmem:[#allocation2 + $0x68] sm:$0xff] %v571_v16  ;;  %v618_v21 = vadd.f32 (!%p774_p12), %v775_v18, %v595_v19  ;;  %v633_v31 = vmax.f32 (!%p774_p12), %v617_v20, 0.0  ;;  %v603_v36 = vld [vmem:[#allocation2 + $0x48] sm:$0xff] (!%p774_p12)  ;;  %v628_v53 = vadd.f32 (!%p774_p12), %v775_v18, %v605_v42 }
 0x13e   : > { %v636_v39 = vmax.f32 %v620_v26, 0.0  ;;  %v626_v48 = vadd.f32 %v775_v18, %v603_v36  ;;  %651 = vst [vmem:[%s1078_s23 + $0x10] sm:$0xff] %v635_v38  ;;  %v641_v55 = vmax.f32 %v625_v47, 0.0  ;;  %v643_v59 = vmax.f32 %v627_v52, 0.0 }
 0x13f   : > { %v634_v32 = vmax.f32 %v618_v21, 0.0  ;;  %649 = vst [vmem:[%s1078_s23] sm:$0xff] %v633_v31  ;;  %v644_v60 = vmax.f32 %v628_v53, 0.0 }
 0x140   : > { %652 = vst [vmem:[%s1078_s23 + $0x18] sm:$0xff] %v636_v39  ;;  %v642_v56 = vmax.f32 %v626_v48, 0.0  ;;  %657 = vst [vmem:[%s1078_s23 + $0x40] sm:$0xff] %v641_v55 }
 0x141   : > { %v600_v29 = vld [vmem:[#allocation2 + $0x30] sm:$0xff]  ;;  %650 = vst [vmem:[%s1078_s23 + $0x8] sm:$0xff] %v634_v32  ;;  %659 = vst [vmem:[%s1078_s23 + $0x50] sm:$0xff] %v643_v59 }
 0x142   : > { %v598_v24 = vld [vmem:[#allocation2 + $0x20] sm:$0xff]  ;;  %v623_v34 = vadd.f32 %v775_v18, %v600_v29  ;;  %v608_v49 = vld [vmem:[#allocation2 + $0x70] sm:$0xff]  ;;  %658 = vst [vmem:[%s1078_s23 + $0x48] sm:$0xff] %v642_v56  ;;  %660 = vst [vmem:[%s1078_s23 + $0x58] sm:$0xff] %v644_v60 }
 0x143   : > { %v621_v27 = vadd.f32 %v775_v18, %v598_v24  ;;  %v601_v30 = vld [vmem:[#allocation2 + $0x38] sm:$0xff]  ;;  %v606_v43 = vld [vmem:[#allocation2 + $0x60] sm:$0xff]  ;;  %v631_v58 = vadd.f32 %v775_v18, %v608_v49 }
 0x144   : > { %v599_v28 = vld [vmem:[#allocation2 + $0x28] sm:$0xff]  ;;  %v624_v41 = vadd.f32 %v775_v18, %v601_v30  ;;  %v639_v46 = vmax.f32 %v623_v34, 0.0  ;;  %v609_v50 = vld [vmem:[#allocation2 + $0x78] sm:$0xff]  ;;  %v629_v54 = vadd.f32 %v775_v18, %v606_v43 }
 0x145   : > { %v622_v33 = vadd.f32 %v775_v18, %v599_v28  ;;  %v637_v40 = vmax.f32 %v621_v27, 0.0  ;;  %v607_v44 = vld [vmem:[#allocation2 + $0x68] sm:$0xff]  ;;  %v632_v62 = vadd.f32 %v775_v18, %v609_v50  ;;  %v647_v0 = vmax.f32 %v631_v58, 0.0 }
 0x146   : > { %v640_v51 = vmax.f32 %v624_v41, 0.0  ;;  %655 = vst [vmem:[%s1078_s23 + $0x30] sm:$0xff] %v639_v46  ;;  %v630_v57 = vadd.f32 %v775_v18, %v607_v44  ;;  %v645_v61 = vmax.f32 %v629_v54, 0.0 }
 0x147   : > { %v638_v45 = vmax.f32 %v622_v33, 0.0  ;;  %653 = vst [vmem:[%s1078_s23 + $0x20] sm:$0xff] %v637_v40  ;;  %v648_v1 = vmax.f32 %v632_v62, 0.0  ;;  %663 = vst [vmem:[%s1078_s23 + $0x70] sm:$0xff] %v647_v0 }
 0x148   : > { %656 = vst [vmem:[%s1078_s23 + $0x38] sm:$0xff] %v640_v51  ;;  %v646_v63 = vmax.f32 %v630_v57, 0.0  ;;  %661 = vst [vmem:[%s1078_s23 + $0x60] sm:$0xff] %v645_v61 }
 0x149   : > { %654 = vst [vmem:[%s1078_s23 + $0x28] sm:$0xff] %v638_v45  ;;  %664 = vst [vmem:[%s1078_s23 + $0x78] sm:$0xff] %v648_v1 }
 0x14a   : > { %662 = vst [vmem:[%s1078_s23 + $0x68] sm:$0xff] %v646_v63 }
 0x14b PF: > { %s13_s18 = sadd.s32 1, %s970_s18   ;;  %s1150_s12 = smov %s950_s13 }
 0x14c   : > { %p10_p13 = scmp.ge.s32.totalorder %s13_s18, 6   ;;  %s1151_s13 = smov %s1044_s25 }
 0x14d   : > { %s1152_s14 = smov %s962_s16  ;;  %s1153_s15 = smov %s966_s17 }
 0x14e   : > { %s1154_s16 = smov %s1157_s19  ;;  %s1155_s17 = smov %s1161_s20 }
 0x14f   :  { %12 = sbr.rel (!%p10_p13) target bundleno = 4 (0x4), region = 117 }

</bundles_post_ra>
